<compile_context>
chip_gen: v7x
topology: tpu7x:2x2x1
jax: 0.10.0
libtpu: 0.0.40
codegen_flags: <defaults>
</compile_context>

<pallas_src>
import jax
import jax.numpy as jnp
from jax import lax
from jax.experimental import pallas as pl
from jax.experimental.pallas import tpu as pltpu


def _unpool_scatter_kernel(start_ref, count_ref, hrow_ref, lrow_ref, h_ref, out_ref):
    # start_ref/count_ref : SMEM (num_row_blocks,) int32 — per-row-block range
    #                       into the sorted scatter lists.
    # hrow_ref            : SMEM (M,) int32 — source row in h (sorted by dest).
    # lrow_ref            : SMEM (M,) int32 — destination row local to its block.
    # h_ref               : VMEM (M, Dn)    — current D-tile of h (resident).
    # out_ref             : VMEM (R, Dn)    — output block.
    i = pl.program_id(1)  # row-block index (inner grid axis)

    # Untouched rows stay zero; blocks with count == 0 are a pure memset.
    out_ref[...] = jnp.zeros_like(out_ref)

    base = start_ref[i]
    cnt = count_ref[i]

    def body(k, carry):
        j = hrow_ref[base + k]                       # h row to copy
        r = lrow_ref[base + k]                       # local destination row
        out_ref[pl.ds(r, 1), :] = h_ref[pl.ds(j, 1), :]
        return carry

    lax.fori_loop(0, cnt, body, 0)


def unpool(g, h, pre_h, idx, *, block_rows=512):
    """JAX/Pallas equivalent of Unpool.forward."""
    del pre_h  # unused in the reference module
    N = g.shape[0]
    M, D = h.shape
    isz = jnp.dtype(h.dtype).itemsize

    if M == 0:
        return g, jnp.zeros((N, D), h.dtype)

    # ---- block sizing ------------------------------------------------------
    # Sublane granularity by element width (f32 -> 8, bf16 -> 16, int8 -> 32).
    sub = {4: 8, 2: 16, 1: 32}.get(isz, 8)
    if N <= block_rows:
        R = N                               # single row block == full dim (legal)
    else:
        R = max(sub, (block_rows // sub) * sub)
    num_row_blocks = pl.cdiv(N, R)

    # D (lane) tiling: keep the resident h tile <= ~8 MiB and the output tile
    # <= ~4 MiB so double-buffered tiles fit VMEM on every generation.
    if D % 128 == 0:
        dn = D
        while (M * dn * isz > 8 * 2**20 or R * dn * isz > 4 * 2**20) and dn % 256 == 0:
            dn //= 2
    else:
        dn = D                              # unusual lane dim: keep full (legal)
    num_d_blocks = pl.cdiv(D, dn)

    # ---- glue: invert/sort the scatter by destination row -------------------
    idx = idx.astype(jnp.int32)
    # TODO(synk): PyTorch raises on out-of-range idx; we clip to avoid OOB DMA.
    dst = jnp.clip(idx, 0, N - 1)
    order = jnp.argsort(dst).astype(jnp.int32)       # stable => last dup wins
    dst_sorted = dst[order]
    blk = dst_sorted // R
    lrow = (dst_sorted - blk * R).astype(jnp.int32)  # row local to its block
    blk_ids = jnp.arange(num_row_blocks, dtype=jnp.int32)
    start = jnp.searchsorted(blk, blk_ids, side="left").astype(jnp.int32)
    end = jnp.searchsorted(blk, blk_ids, side="right").astype(jnp.int32)
    count = end - start

    # Memory-bound profile: ~N*D write + M*D read + tiny scalar tables.
    cost = pl.CostEstimate(
        flops=0,
        transcendentals=0,
        bytes_accessed=N * D * isz + M * D * isz + (2 * M + 2 * num_row_blocks) * 4,
    )

    # Explicit VMEM budget with headroom (stays well under v7x's 64 MiB/TC).
    vmem_limit = int(min(56 * 2**20,
                         max(16 * 2**20, 3 * (M + R) * dn * isz + (4 << 20))))

    grid_spec = pltpu.PrefetchScalarGridSpec(
        num_scalar_prefetch=4,
        grid=(num_d_blocks, num_row_blocks),
        in_specs=[
            # h D-tile; index map depends only on the outer d axis -> fetched
            # once per d tile and VMEM-resident across all row blocks.
            pl.BlockSpec((M, dn), lambda jd, i, *_: (0, jd)),
        ],
        out_specs=pl.BlockSpec((R, dn), lambda jd, i, *_: (i, jd)),
    )

    new_h = pl.pallas_call(
        _unpool_scatter_kernel,
        out_shape=jax.ShapeDtypeStruct((N, D), h.dtype),
        grid_spec=grid_spec,
        compiler_params=pltpu.CompilerParams(
            dimension_semantics=("parallel", "parallel"),
            vmem_limit_bytes=vmem_limit,
        ),
        cost_estimate=cost,
    )(start, count, order, lrow, h)

    return g, new_h


if __name__ == "__main__":
    key = jax.random.PRNGKey(0)
    k_g, k_h, k_pre, k_idx = jax.random.split(key, 4)

    N, Dg = 16, 64    # g: [N, Dg]
    M, D = 8, 128     # h: [M, D]

    g = jax.random.normal(k_g, (N, Dg), dtype=jnp.float32)
    h = jax.random.normal(k_h, (M, D), dtype=jnp.float32)
    pre_h = jax.random.normal(k_pre, (M, D), dtype=jnp.float32)
    # distinct target rows (matches the typical graph-unpool usage)
    idx = jax.random.permutation(k_idx, N)[:M].astype(jnp.int32)

    g_out, new_h = unpool(g, h, pre_h, idx)
    jax.block_until_ready((g_out, new_h))

    # Reference check (plain JAX)
    ref = jnp.zeros((N, D), dtype=h.dtype).at[idx].set(h)
    assert g_out.shape == g.shape and jnp.array_equal(g_out, g)
    assert new_h.shape == (N, D) and new_h.dtype == h.dtype
    assert jnp.allclose(new_h, ref)

    print("KERNEL_OK")
</pallas_src>

<mosaic_0001>
module attributes {stable_mosaic.version = 11 : i64} {
  func.func @_unpool_scatter_kernel(%arg0: i32, %arg1: i32, %arg2: memref<1xi32, #tpu.memory_space<smem>>, %arg3: memref<1xi32, #tpu.memory_space<smem>>, %arg4: memref<8xi32, #tpu.memory_space<smem>>, %arg5: memref<8xi32, #tpu.memory_space<smem>>, %arg6: memref<8x128xf32, #tpu.memory_space<vmem>>, %arg7: memref<16x128xf32, #tpu.memory_space<vmem>>) attributes {dimension_semantics = [#tpu.dimension_semantics<parallel>, #tpu.dimension_semantics<parallel>], iteration_bounds = array<i64: 1, 1>, scalar_prefetch = 4 : i64, scratch_operands = 0 : i64, tpu.core_type = #tpu.core_type<tc>, window_params = [{transform_indices = @transform_0, window_bounds = array<i64: 8, 128>}, {transform_indices = @transform_1, window_bounds = array<i64: 16, 128>}]} {
    %cst = arith.constant 0.000000e+00 : f32
    %0 = vector.broadcast %cst : f32 to vector<16x128xf32>
    %c0 = arith.constant 0 : index
    %c0_0 = arith.constant 0 : index
    %1 = vector.load %arg7[%c0, %c0_0] : memref<16x128xf32, #tpu.memory_space<vmem>>, vector<16x128xf32>
    tpu.vector_store %arg7[%c0, %c0_0], %0 {strides = array<i32>} : memref<16x128xf32, #tpu.memory_space<vmem>>, vector<16x128xf32>,
    %2 = arith.index_cast %arg1 : i32 to index
    %3 = memref.load %arg2[%2] : memref<1xi32, #tpu.memory_space<smem>>
    %4 = arith.index_cast %arg1 : i32 to index
    %5 = memref.load %arg3[%4] : memref<1xi32, #tpu.memory_space<smem>>
    %c0_i32 = arith.constant 0 : i32
    %c0_i32_1 = arith.constant 0 : i32
    %6 = arith.subi %5, %c0_i32_1 : i32
    %7 = arith.addi %c0_i32_1, %6 : i32
    %c1_i32 = arith.constant 1 : i32
    scf.for %arg8 = %c0_i32_1 to %7 step %c1_i32  : i32 {
      %8 = arith.addi %3, %arg8 : i32
      %9 = arith.index_cast %8 : i32 to index
      %10 = memref.load %arg4[%9] : memref<8xi32, #tpu.memory_space<smem>>
      %11 = arith.addi %3, %arg8 : i32
      %12 = arith.index_cast %11 : i32 to index
      %13 = memref.load %arg5[%12] : memref<8xi32, #tpu.memory_space<smem>>
      %14 = arith.index_cast %10 : i32 to index
      %c0_2 = arith.constant 0 : index
      %15 = vector.load %arg6[%14, %c0_2] : memref<8x128xf32, #tpu.memory_space<vmem>>, vector<1x128xf32>
      %16 = arith.index_cast %13 : i32 to index
      %c0_3 = arith.constant 0 : index
      %17 = vector.load %arg7[%16, %c0_3] : memref<16x128xf32, #tpu.memory_space<vmem>>, vector<1x128xf32>
      tpu.vector_store %arg7[%16, %c0_3], %15 {strides = array<i32>} : memref<16x128xf32, #tpu.memory_space<vmem>>, vector<1x128xf32>,
    }
    return
  }
  func.func @transform_0(%arg0: i32, %arg1: i32, %arg2: memref<1xi32, #tpu.memory_space<smem>>, %arg3: memref<1xi32, #tpu.memory_space<smem>>, %arg4: memref<8xi32, #tpu.memory_space<smem>>, %arg5: memref<8xi32, #tpu.memory_space<smem>>) -> (i32, i32) {
    %c0_i32 = arith.constant 0 : i32
    %c0_i32_0 = arith.constant 0 : i32
    return %c0_i32, %arg0 : i32, i32
  }
  func.func @transform_1(%arg0: i32, %arg1: i32, %arg2: memref<1xi32, #tpu.memory_space<smem>>, %arg3: memref<1xi32, #tpu.memory_space<smem>>, %arg4: memref<8xi32, #tpu.memory_space<smem>>, %arg5: memref<8xi32, #tpu.memory_space<smem>>) -> (i32, i32) {
    %c0_i32 = arith.constant 0 : i32
    return %arg1, %arg0 : i32, i32
  }
}

</mosaic_0001>

<bundles_post_ra>
// kernel: tpu_custom_call.1
= control target key start
LH: loop header
LB: loop body
LE: loop exit
PB: predicated region body
PF: predicated region fallthrough
CT: control target
= control target key end

     0   :  { %s204_s0 = inlined_call_operand.<no memory space> [shape: s32[1], index: 0, kind: input, shape index: {}]   ;;  %s205_s1 = inlined_call_operand.<no memory space> [shape: s32[1], index: 1, kind: input, shape index: {}]   ;;  %s206_s2 = inlined_call_operand.vmem [shape: s32[8], index: 2, kind: input, shape index: {}]   ;;  %s207_s4 = inlined_call_operand.vmem [shape: f32[8,128], index: 4, kind: input, shape index: {}]   ;;  %s208_s5 = inlined_call_operand.hbm [shape: f32[16,128], index: 5, kind: output, shape index: {}]   ;;  %s209_s3 = inlined_call_operand.vmem [shape: s32[8], index: 3, kind: input, shape index: {}]  }
   0x1   :  { %s12_s20 = sshll.u32 %s206_s2, 4  ;;  %s16_s23 = sshll.u32 %s209_s3, 4  ;;  %s13_s20 = int_to_ptr.vmem [resolvable:$true] %s12_s20  ;;  %s17_s23 = int_to_ptr.vmem [resolvable:$true] %s16_s23 }
   0x2   :  { %s80_s24 = scalar_lea.vmem %s13_s20, 16  ;;  %p85_p1 = scmp.lt.s32.totalorder %s13_s20, %s13_s20 }
   0x3   :  { %p81_p0 = scmp.ne.s32.totalorder %s13_s20, %s80_s24  ;;  %p86_p2 = scmp.lt.s32.totalorder %s80_s24, %s80_s24 }
   0x5   :  { %p87_p3 = por %p86_p2, %p85_p1 }
   0x7   :  { %p88_p4 = pnand %p87_p3, %p81_p0 }
   0x9   :  { %91 = shalt.err (!%p88_p4)  }
   0xa   :  { %s138_s25 = smov [#allocation5]   ;;  %s92_s26 = scalar_lea.vmem %s17_s23, 16 }
   0xb   :  { %15 = dma.vmem_to_smem %s13_s20, 16, %s138_s25, [#allocation2] }
   0xc   :  { %p93_p5 = scmp.ne.s32.totalorder %s17_s23, %s92_s26  ;;  %p97_p6 = scmp.lt.s32.totalorder %s17_s23, %s17_s23 }
   0xd   :  { %p98_p7 = scmp.lt.s32.totalorder %s92_s26, %s92_s26 }
   0xf   :  { %p99_p8 = por %p98_p7, %p97_p6 }
  0x11   :  { %p100_p9 = pnand %p99_p8, %p93_p5 }
  0x13   :  { %103 = shalt.err (!%p100_p9)  }
  0x14   :  { %s139_s2 = smov [#allocation6]  }
  0x15   :  { %19 = dma.vmem_to_smem %s17_s23, 16, %s139_s2, [#allocation2] }
  0x16   :  { %130 = dma.done.wait [#allocation2], 32 }
  0x17   :  { %131 = vsyncadd [#allocation2], 4294967264 }
  0x18   :  { %21 = sfence }
  0x19   :  { %22 = vsyncpa [#allocation8], 0  ;;  %v140_v0 = vmov 0.0   ;;  %p65_p10 = scmp.le.s32.totalorder %s205_s1, 0 }
  0x1a   :  { %25 = vst [vmem:[#allocation7] sm:$0xff] %v140_v0  ;;  %26 = vst [vmem:[#allocation7 + $0x8] sm:$0xff] %v140_v0  ;;  %s134_s28 = smov (!%p65_p10), 0  }
  0x1b   :  { %62 = sbr.rel (%p65_p10) target bundleno = 44 (0x2c), region = 27 }
  0x22 LB: > { %s35_s6 = sadd.s32 %s136_s28, %s204_s0  ;;  %s32_s28 = sadd.s32 1, %s136_s28   ;;  %s136_s28 = sphi %s134_s28, %s32_s28  }
  0x23   : > { %s36_s7 = sld [smem:[#allocation5 + %s35_s6]]  ;;  %p31_p11 = scmp.ge.s32.totalorder %s32_s28, %s205_s1 }
  0x24   : > { %s37_s8 = sld [smem:[#allocation6 + %s35_s6]] }
  0x25   :  { %34 = sbr.rel (!%p31_p11) target bundleno = 34 (0x22), region = 33 }
  0x29   : > { %s38_s11 = scalar_lea.vmem %s207_s4, %s36_s7 }
  0x2a   : > { %v39_v1 = vld [vmem:[%s38_s11] sm:$0x1]  ;;  %s40_s12 = scalar_lea.vmem [#allocation7], %s37_s8 }
  0x2b   : > { %41 = vst [vmem:[%s40_s12] sm:$0x1] %v39_v1 }
  0x2c PF:  { %s141_s15 = smov [#allocation7]  }
  0x2d   :  { %s47_s16 = sshll.u32 %s141_s15, 4  ;;  %s48_s16 = int_to_ptr.vmem [resolvable:$true] %s47_s16 }
  0x2e   :  { %s104_s17 = scalar_lea.vmem %s48_s16, 256  ;;  %p109_p13 = scmp.lt.s32.totalorder %s48_s16, %s48_s16 }
  0x2f   :  { %p105_p12 = scmp.ne.s32.totalorder %s48_s16, %s104_s17  ;;  %p110_p0 = scmp.lt.s32.totalorder %s104_s17, %s104_s17 }
  0x31   :  { %p111_p1 = por %p110_p0, %p109_p13 }
  0x33   :  { %p112_p2 = pnand %p111_p1, %p105_p12 }
  0x35   :  { %115 = shalt.err (!%p112_p2)
}
  0x36   :  { %s116_s20 = scalar_lea.hbm %s208_s5, 256 }
  0x37   :  { %p117_p3 = scmp.ne.s32.totalorder %s208_s5, %s116_s20  ;;  %p120_p4 = scmp.lt.u32.totalorder %s116_s20, %s208_s5 }
  0x39   :  { %p122_p5 = pnand %p120_p4, %p117_p3 }
  0x3b   :  { %125 = shalt.err (!%p122_p5)
}
  0x3c   :  { %s142_s1 = smov 128   ;;  %s143_s4 = smov 8  }
  0x3d   :  { %53 = dma.vmem_to_hbm [thread:$0]  %s48_s16, 256, %s208_s5, [#allocation8], %s142_s1, %s142_s1, %s143_s4  }
  0x3e   :  { %132 = dma.done.wait [#allocation8], 256  }
  0x3f   :  { %133 = vsyncadd [#allocation8], 4294967040 }
  0x40   :  { %57 = vsyncpa [#allocation8], 1 }

</bundles_post_ra>
